<compile_context>
chip_gen: v7x
topology: tpu7x:2x2x1
jax: 0.10.0
libtpu: 0.0.40
codegen_flags: <defaults>
</compile_context>

<pallas_src>
import jax
import jax.numpy as jnp
from jax.experimental import pallas as pl
from jax.experimental.pallas import tpu as pltpu

COMPUTE_DTYPE = jnp.bfloat16  # bf16 operands, f32 accumulation on the MXU


# ---------------------------------------------------------------------------
# Kernel
# ---------------------------------------------------------------------------
def gnn2_kernel(x_ref, adj_ref,
                w01_ref, b01_ref,      # fused encoder + p_lin1
                wg_ref, bg_ref,        # GCNConv linear part
                wh_ref, bh_ref,        # fused heads [p_out | p_comm_out | v_out]
                out_ref):
    f32 = jnp.float32
    x = x_ref[...]          # (BT*N, OB)     bf16
    adj = adj_ref[...]      # (BT*N, BT*N)   bf16 block-diag normalized (A+I)

    # fused encoder o p_lin1 (Linear o Linear), ReLU on the f32 accumulator
    f = jnp.dot(x, w01_ref[...], preferred_element_type=f32) + b01_ref[...]
    f = jnp.maximum(f, 0.0).astype(x.dtype)

    # p_conv2: GCNConv -> A_hat @ (f @ Wg) + bg, then ReLU
    h = jnp.dot(f, wg_ref[...], preferred_element_type=f32).astype(x.dtype)
    g = jnp.dot(adj, h, preferred_element_type=f32) + bg_ref[...]
    g = jnp.maximum(g, 0.0).astype(x.dtype)

    # fused output heads -> single lane-dense 128-wide slab (f32 writeback)
    out = jnp.dot(g, wh_ref[...], preferred_element_type=f32) + bh_ref[...]
    out_ref[...] = out.astype(out_ref.dtype)


# ---------------------------------------------------------------------------
# Wrapper / glue
# ---------------------------------------------------------------------------
def gnn2_forward(x, adj_bd, pp, out_dim, bt):
    """Batched forward.

    x:      (B, N, ob_dim) f32 observations (B env/timestep passes).
    adj_bd: (B//bt, bt*N, bt*N) bf16 block-diagonal normalized adjacency
            (precomputed once per rollout — topology is static).
    """
    B, N, OB = x.shape
    nb = adj_bd.shape[0]
    btn = bt * N
    assert B == nb * bt, "batch must be a multiple of the batch block"
    assert adj_bd.shape[1] == btn and adj_bd.shape[2] == btn
    H1P = pp["w01"].shape[1]
    HEADP = pp["wh"].shape[1]

    # Fold (B, N) into the matmul M dimension; keep the natural feature dim
    # (no zero-padding of K).
    x_flat = x.reshape(B * N, OB).astype(COMPUTE_DTYPE)
    weights = (pp["w01"], pp["b01"], pp["wg"], pp["bg"], pp["wh"], pp["bh"])

    # cost estimate reflects the de-padded x and the block-diag aggregation
    flops = 2 * B * N * (OB * H1P + H1P * H1P + btn * H1P + H1P * HEADP)
    bytes_accessed = (x_flat.size * x_flat.dtype.itemsize
                      + adj_bd.size * adj_bd.dtype.itemsize
                      + sum(int(w.size) * w.dtype.itemsize for w in weights)
                      + B * N * HEADP * 4)
    cost = pl.CostEstimate(flops=int(flops), transcendentals=0,
                           bytes_accessed=int(bytes_accessed))

    grid_spec = pltpu.PrefetchScalarGridSpec(
        num_scalar_prefetch=0,
        grid=(nb,),
        in_specs=[
            # per-block tensors: tiled over the batch-block axis
            pl.BlockSpec((btn, OB), lambda b: (b, 0)),
            pl.BlockSpec((None, btn, btn), lambda b: (b, 0, 0)),
            # weights/biases: constant block index -> stay VMEM-resident
            pl.BlockSpec((OB, H1P), lambda b: (0, 0)),
            pl.BlockSpec((1, H1P), lambda b: (0, 0)),
            pl.BlockSpec((H1P, H1P), lambda b: (0, 0)),
            pl.BlockSpec((1, H1P), lambda b: (0, 0)),
            pl.BlockSpec((H1P, HEADP), lambda b: (0, 0)),
            pl.BlockSpec((1, HEADP), lambda b: (0, 0)),
        ],
        out_specs=pl.BlockSpec((btn, HEADP), lambda b: (b, 0)),
    )

    out = pl.pallas_call(
        gnn2_kernel,
        out_shape=jax.ShapeDtypeStruct((B * N, HEADP), jnp.float32),
        grid_spec=grid_spec,
        compiler_params=pltpu.CompilerParams(
            dimension_semantics=("parallel",)),   # >=2 steps -> both v7x TCs busy
        cost_estimate=cost,
    )(x_flat, adj_bd, *weights)

    out = out.reshape(B, N, HEADP)
    act_logits = out[..., :out_dim]
    comm_logits = out[..., out_dim:out_dim + 2]
    v = out[..., out_dim + 2:out_dim + 3]
    return act_logits, comm_logits, v


def build_gcn_adj(edge_index, num_nodes):
    """Dense normalized adjacency matching PyG GCNConv (add self-loops,
    symmetric deg^-1/2 normalization). edge_index: [2, E] (src, dst)."""
    src, dst = edge_index[0], edge_index[1]
    a = jnp.zeros((num_nodes, num_nodes), jnp.float32)
    a = a.at[dst, src].add(1.0)                    # message flows src -> dst
    a = a + jnp.eye(num_nodes, dtype=jnp.float32)  # self-loops
    deg = a.sum(axis=1)
    dinv = jnp.where(deg > 0, 1.0 / jnp.sqrt(deg), 0.0)
    return dinv[:, None] * a * dinv[None, :]


def build_blockdiag_adj(adj, bt, dtype=COMPUTE_DTYPE):
    """(B, N, N) per-graph normalized adjacencies -> (B//bt, bt*N, bt*N)
    block-diagonal matrices.  Off-diagonal blocks are EXACT zeros (0/1 identity
    mask, computed before the bf16 cast), so graphs cannot exchange messages.
    Built once per rollout (static topology), outside the per-call jitted path."""
    B, N, _ = adj.shape
    assert B % bt == 0
    nb = B // bt
    a = adj.reshape(nb, bt, N, N)
    eye = jnp.eye(bt, dtype=adj.dtype)
    bd = jnp.einsum('gh,kgij->kgihj', eye, a)           # exact zeros off-diag
    return bd.reshape(nb, bt * N, bt * N).astype(dtype)


def init_params(key, ob_dim, h0, h1, out_dim):
    ks = jax.random.split(key, 7)
    def lin(k, fan_in, fan_out):
        w = jax.random.normal(k, (fan_in, fan_out), jnp.float32) / jnp.sqrt(fan_in)
        b = jnp.zeros((1, fan_out), jnp.float32)
        return w, b
    we, be = lin(ks[0], ob_dim, h0)
    w1, b1 = lin(ks[1], h0, h1)
    wg, bg = lin(ks[2], h1, h1)
    wo, bo = lin(ks[3], h1, out_dim)
    wc, bc = lin(ks[4], h1, 2)
    wv, bv = lin(ks[5], h1, 1)
    return dict(we=we, be=be, w1=w1, b1=b1, wg=wg, bg=bg,
                wo=wo, bo=bo, wc=wc, bc=bc, wv=wv, bv=bv)


def prepare_params(params, h1p=128, headp=128, dtype=COMPUTE_DTYPE):
    """Fuse encoder+p_lin1 and the three heads; pad only output/lane dims to
    128 (K of the first matmul stays at ob_dim — no x padding needed)."""
    # algebraic fusion (exact: no nonlinearity between encoder and p_lin1)
    w01 = params["we"] @ params["w1"]                      # (ob_dim, H1)
    b01 = params["be"] @ params["w1"] + params["b1"]       # (1, H1)
    # fused heads: [p_out | p_comm_out | v_out]
    wh = jnp.concatenate([params["wo"], params["wc"], params["wv"]], axis=1)
    bh = jnp.concatenate([params["bo"], params["bc"], params["bv"]], axis=1)

    def pad_cols(a, cols):
        return jnp.pad(a, ((0, 0), (0, cols - a.shape[1])))

    def pad2(a, rows, cols):
        return jnp.pad(a, ((0, rows - a.shape[0]), (0, cols - a.shape[1])))

    return dict(
        w01=pad_cols(w01, h1p).astype(dtype),              # (ob_dim, 128)
        b01=pad_cols(b01, h1p).astype(jnp.float32),
        wg=pad2(params["wg"], h1p, h1p).astype(dtype),
        bg=pad_cols(params["bg"], h1p).astype(jnp.float32),
        wh=pad2(wh, h1p, headp).astype(dtype),
        bh=pad_cols(bh, headp).astype(jnp.float32),
    )


# ---------------------------------------------------------------------------
# References
# ---------------------------------------------------------------------------
def _mm(a, b):
    return jnp.dot(a, b, precision=jax.lax.Precision.HIGHEST)


def gnn2_reference_f32(x, adj, p):
    """Original (unfused, full-precision) module semantics, vmapped over batch."""
    def one(xb, ab):
        f = _mm(xb, p["we"]) + p["be"]
        f = jnp.maximum(_mm(f, p["w1"]) + p["b1"], 0.0)
        g = jnp.maximum(_mm(ab, _mm(f, p["wg"])) + p["bg"], 0.0)
        return (_mm(g, p["wo"]) + p["bo"],
                _mm(g, p["wc"]) + p["bc"],
                _mm(g, p["wv"]) + p["bv"])
    return jax.vmap(one)(x, adj)


def gnn2_reference_quantized(x, adj, pp, out_dim):
    """Mirror of the kernel math (fused, bf16 operands, f32 accumulate).
    Per-graph form; equivalent to the block-diag kernel because off-diagonal
    blocks are exactly zero."""
    f32 = jnp.float32
    dt = COMPUTE_DTYPE
    def one(xb, ab):
        xb = xb.astype(dt); ab = ab.astype(dt)
        f = _mm(xb.astype(f32), pp["w01"].astype(f32)) + pp["b01"]
        f = jnp.maximum(f, 0.0).astype(dt)
        h = _mm(f.astype(f32), pp["wg"].astype(f32)).astype(dt)
        g = _mm(ab.astype(f32), h.astype(f32)) + pp["bg"]
        g = jnp.maximum(g, 0.0).astype(dt)
        return _mm(g.astype(f32), pp["wh"].astype(f32)) + pp["bh"]
    out = jax.vmap(one)(x, adj)
    return (out[..., :out_dim],
            out[..., out_dim:out_dim + 2],
            out[..., out_dim + 2:out_dim + 3])


# ---------------------------------------------------------------------------
# Demo / self-check
# ---------------------------------------------------------------------------
if __name__ == "__main__":
    # shapes consistent with the module: N=8 agents, ob_dim=16,
    # policy_size=(32, 32), policy_out_dim=4.
    N, OB, H0, H1, OUT = 8, 16, 32, 32, 4
    # BT*N = 256 fills the 256x256 MXU M dimension on v6e/v7x (>=128 for v5e);
    # B//BT = 2 grid steps so both v7x TensorCores get work.
    B, BT = 64, 32

    key = jax.random.PRNGKey(0)
    kx, kp = jax.random.split(key)
    x = jax.random.normal(kx, (B, N, OB), jnp.float32)

    # symmetric ring communication graph (same topology for every env)
    src = jnp.arange(N)
    dst = (src + 1) % N
    edge_index = jnp.stack([jnp.concatenate([src, dst]),
                            jnp.concatenate([dst, src])], axis=0)
    adj1 = build_gcn_adj(edge_index, N)
    adj = jnp.broadcast_to(adj1, (B, N, N))

    params = init_params(kp, OB, H0, H1, OUT)
    pp = prepare_params(params)
    # static per rollout: built & cast to bf16 once, outside the jitted path
    adj_bd = build_blockdiag_adj(adj, BT)

    fwd = jax.jit(lambda xx, aa: gnn2_forward(xx, aa, pp, OUT, BT))
    act_logits, comm_logits, v = fwd(x, adj_bd)
    jax.block_until_ready((act_logits, comm_logits, v))
    assert act_logits.shape == (B, N, OUT)
    assert comm_logits.shape == (B, N, 2)
    assert v.shape == (B, N, 1)

    # 1) tight check: kernel vs a reference applying the exact same fusion and
    #    bf16 quantization (only f32 accumulation order differs).
    qa, qc, qv = gnn2_reference_quantized(x, adj, pp, OUT)
    assert jnp.allclose(act_logits, qa, atol=1e-2), float(jnp.max(jnp.abs(act_logits - qa)))
    assert jnp.allclose(comm_logits, qc, atol=1e-2), float(jnp.max(jnp.abs(comm_logits - qc)))
    assert jnp.allclose(v, qv, atol=1e-2), float(jnp.max(jnp.abs(v - qv)))

    # 2) semantic check vs the original unfused full-precision module math
    #    (remaining difference is bf16 weight/activation quantization only).
    ra, rc, rv = gnn2_reference_f32(x, adj, params)
    for got, ref in ((act_logits, ra), (comm_logits, rc), (v, rv)):
        assert jnp.allclose(got, ref, rtol=0.1, atol=0.1), float(jnp.max(jnp.abs(got - ref)))

    # TODO(synk): Categorical(logits=...) distribution objects are host-side
    # wrappers with no kernel compute; the kernel returns the logits / value.
    print("KERNEL_OK")
</pallas_src>

<mosaic_0001>
module attributes {stable_mosaic.version = 11 : i64} {
  func.func @gnn2_kernel(%arg0: i32, %arg1: memref<256x16xbf16, #tpu.memory_space<vmem>>, %arg2: memref<1x256x256xbf16, #tpu.memory_space<vmem>>, %arg3: memref<16x128xbf16, #tpu.memory_space<vmem>>, %arg4: memref<1x128xf32, #tpu.memory_space<vmem>>, %arg5: memref<128x128xbf16, #tpu.memory_space<vmem>>, %arg6: memref<1x128xf32, #tpu.memory_space<vmem>>, %arg7: memref<128x128xbf16, #tpu.memory_space<vmem>>, %arg8: memref<1x128xf32, #tpu.memory_space<vmem>>, %arg9: memref<256x128xf32, #tpu.memory_space<vmem>>) attributes {dimension_semantics = [#tpu.dimension_semantics<parallel>], iteration_bounds = array<i64: 2>, scalar_prefetch = 0 : i64, scratch_operands = 0 : i64, tpu.core_type = #tpu.core_type<tc>, window_params = [{transform_indices = @transform_0, window_bounds = array<i64: 256, 16>}, {transform_indices = @transform_1, window_bounds = array<i64: 1, 256, 256>}, {pipeline_mode = #tpu.pipeline_mode<synchronous>, transform_indices = @transform_2, window_bounds = array<i64: 16, 128>}, {pipeline_mode = #tpu.pipeline_mode<synchronous>, transform_indices = @transform_3, window_bounds = array<i64: 1, 128>}, {pipeline_mode = #tpu.pipeline_mode<synchronous>, transform_indices = @transform_4, window_bounds = array<i64: 128, 128>}, {pipeline_mode = #tpu.pipeline_mode<synchronous>, transform_indices = @transform_5, window_bounds = array<i64: 1, 128>}, {pipeline_mode = #tpu.pipeline_mode<synchronous>, transform_indices = @transform_6, window_bounds = array<i64: 128, 128>}, {pipeline_mode = #tpu.pipeline_mode<synchronous>, transform_indices = @transform_7, window_bounds = array<i64: 1, 128>}, {transform_indices = @transform_8, window_bounds = array<i64: 256, 128>}]} {
    %c0 = arith.constant 0 : index
    %c0_0 = arith.constant 0 : index
    %0 = vector.load %arg1[%c0, %c0_0] : memref<256x16xbf16, #tpu.memory_space<vmem>>, vector<256x16xbf16>
    %c0_1 = arith.constant 0 : index
    %c0_2 = arith.constant 0 : index
    %c0_3 = arith.constant 0 : index
    %1 = vector.load %arg2[%c0_1, %c0_2, %c0_3] : memref<1x256x256xbf16, #tpu.memory_space<vmem>>, vector<1x256x256xbf16>
    %2 = vector.shape_cast %1 : vector<1x256x256xbf16> to vector<256x256xbf16>
    %c0_4 = arith.constant 0 : index
    %c0_5 = arith.constant 0 : index
    %3 = vector.load %arg3[%c0_4, %c0_5] : memref<16x128xbf16, #tpu.memory_space<vmem>>, vector<16x128xbf16>
    %cst = arith.constant dense<0.000000e+00> : vector<256x128xf32>
    %4 = tpu.matmul %0, %3, %cst {dimension_numbers = #tpu.dot_dimension_numbers<[1], [0], [0], [1], [0, 0, 1, 1], [], []>} : vector<256x16xbf16>, vector<16x128xbf16>, vector<256x128xf32> -> vector<256x128xf32>
    %c0_6 = arith.constant 0 : index
    %c0_7 = arith.constant 0 : index
    %5 = vector.load %arg4[%c0_6, %c0_7] : memref<1x128xf32, #tpu.memory_space<vmem>>, vector<1x128xf32>
    %6 = vector.broadcast %5 : vector<1x128xf32> to vector<256x128xf32>
    %7 = arith.addf %4, %6 : vector<256x128xf32>
    %cst_8 = arith.constant 0.000000e+00 : f32
    %8 = vector.broadcast %cst_8 : f32 to vector<256x128xf32>
    %9 = arith.maximumf %7, %8 : vector<256x128xf32>
    %10 = arith.truncf %9 : vector<256x128xf32> to vector<256x128xbf16>
    %c0_9 = arith.constant 0 : index
    %c0_10 = arith.constant 0 : index
    %11 = vector.load %arg5[%c0_9, %c0_10] : memref<128x128xbf16, #tpu.memory_space<vmem>>, vector<128x128xbf16>
    %cst_11 = arith.constant dense<0.000000e+00> : vector<256x128xf32>
    %12 = tpu.matmul %10, %11, %cst_11 {dimension_numbers = #tpu.dot_dimension_numbers<[1], [0], [0], [1], [0, 0, 1, 1], [], []>} : vector<256x128xbf16>, vector<128x128xbf16>, vector<256x128xf32> -> vector<256x128xf32>
    %13 = arith.truncf %12 : vector<256x128xf32> to vector<256x128xbf16>
    %cst_12 = arith.constant dense<0.000000e+00> : vector<256x128xf32>
    %14 = tpu.matmul %2, %13, %cst_12 {dimension_numbers = #tpu.dot_dimension_numbers<[1], [0], [0], [1], [0, 0, 1, 1], [], []>} : vector<256x256xbf16>, vector<256x128xbf16>, vector<256x128xf32> -> vector<256x128xf32>
    %c0_13 = arith.constant 0 : index
    %c0_14 = arith.constant 0 : index
    %15 = vector.load %arg6[%c0_13, %c0_14] : memref<1x128xf32, #tpu.memory_space<vmem>>, vector<1x128xf32>
    %16 = vector.broadcast %15 : vector<1x128xf32> to vector<256x128xf32>
    %17 = arith.addf %14, %16 : vector<256x128xf32>
    %cst_15 = arith.constant 0.000000e+00 : f32
    %18 = vector.broadcast %cst_15 : f32 to vector<256x128xf32>
    %19 = arith.maximumf %17, %18 : vector<256x128xf32>
    %20 = arith.truncf %19 : vector<256x128xf32> to vector<256x128xbf16>
    %c0_16 = arith.constant 0 : index
    %c0_17 = arith.constant 0 : index
    %21 = vector.load %arg7[%c0_16, %c0_17] : memref<128x128xbf16, #tpu.memory_space<vmem>>, vector<128x128xbf16>
    %cst_18 = arith.constant dense<0.000000e+00> : vector<256x128xf32>
    %22 = tpu.matmul %20, %21, %cst_18 {dimension_numbers = #tpu.dot_dimension_numbers<[1], [0], [0], [1], [0, 0, 1, 1], [], []>} : vector<256x128xbf16>, vector<128x128xbf16>, vector<256x128xf32> -> vector<256x128xf32>
    %c0_19 = arith.constant 0 : index
    %c0_20 = arith.constant 0 : index
    %23 = vector.load %arg8[%c0_19, %c0_20] : memref<1x128xf32, #tpu.memory_space<vmem>>, vector<1x128xf32>
    %24 = vector.broadcast %23 : vector<1x128xf32> to vector<256x128xf32>
    %25 = arith.addf %22, %24 : vector<256x128xf32>
    %c0_21 = arith.constant 0 : index
    %c0_22 = arith.constant 0 : index
    %26 = vector.load %arg9[%c0_21, %c0_22] : memref<256x128xf32, #tpu.memory_space<vmem>>, vector<256x128xf32>
    tpu.vector_store %arg9[%c0_21, %c0_22], %25 {strides = array<i32>} : memref<256x128xf32, #tpu.memory_space<vmem>>, vector<256x128xf32>,
    return
  }
  func.func @transform_0(%arg0: i32) -> (i32, i32) {
    %c0_i32 = arith.constant 0 : i32
    %c0_i32_0 = arith.constant 0 : i32
    return %arg0, %c0_i32 : i32, i32
  }
  func.func @transform_1(%arg0: i32) -> (i32, i32, i32) {
    %c0_i32 = arith.constant 0 : i32
    %c0_i32_0 = arith.constant 0 : i32
    %c0_i32_1 = arith.constant 0 : i32
    return %arg0, %c0_i32, %c0_i32_0 : i32, i32, i32
  }
  func.func @transform_2(%arg0: i32) -> (i32, i32) {
    %c0_i32 = arith.constant 0 : i32
    %c0_i32_0 = arith.constant 0 : i32
    %c0_i32_1 = arith.constant 0 : i32
    return %c0_i32, %c0_i32_0 : i32, i32
  }
  func.func @transform_3(%arg0: i32) -> (i32, i32) {
    %c0_i32 = arith.constant 0 : i32
    %c0_i32_0 = arith.constant 0 : i32
    %c0_i32_1 = arith.constant 0 : i32
    return %c0_i32, %c0_i32_0 : i32, i32
  }
  func.func @transform_4(%arg0: i32) -> (i32, i32) {
    %c0_i32 = arith.constant 0 : i32
    %c0_i32_0 = arith.constant 0 : i32
    %c0_i32_1 = arith.constant 0 : i32
    return %c0_i32, %c0_i32_0 : i32, i32
  }
  func.func @transform_5(%arg0: i32) -> (i32, i32) {
    %c0_i32 = arith.constant 0 : i32
    %c0_i32_0 = arith.constant 0 : i32
    %c0_i32_1 = arith.constant 0 : i32
    return %c0_i32, %c0_i32_0 : i32, i32
  }
  func.func @transform_6(%arg0: i32) -> (i32, i32) {
    %c0_i32 = arith.constant 0 : i32
    %c0_i32_0 = arith.constant 0 : i32
    %c0_i32_1 = arith.constant 0 : i32
    return %c0_i32, %c0_i32_0 : i32, i32
  }
  func.func @transform_7(%arg0: i32) -> (i32, i32) {
    %c0_i32 = arith.constant 0 : i32
    %c0_i32_0 = arith.constant 0 : i32
    %c0_i32_1 = arith.constant 0 : i32
    return %c0_i32, %c0_i32_0 : i32, i32
  }
  func.func @transform_8(%arg0: i32) -> (i32, i32) {
    %c0_i32 = arith.constant 0 : i32
    %c0_i32_0 = arith.constant 0 : i32
    return %arg0, %c0_i32 : i32, i32
  }
}

</mosaic_0001>

<bundles_post_ra>
// kernel: _lambda_.1
= control target key start
LH: loop header
LB: loop body
LE: loop exit
PB: predicated region body
PF: predicated region fallthrough
CT: control target
= control target key end

     0   :  { %13 = vsyncpa [#allocation3], 0  ;;  %s2715_s0 = inlined_call_operand.vmem [shape: bf16[512,16], index: 0, kind: input, shape index: {}]   ;;  %s2716_s1 = inlined_call_operand.vmem [shape: bf16[2,256,256], index: 1, kind: input, shape index: {}]   ;;  %s2717_s2 = inlined_call_operand.vmem [shape: bf16[16,128], index: 2, kind: input, shape index: {}]   ;;  %s2718_s3 = inlined_call_operand.vmem [shape: f32[1,128], index: 3, kind: input, shape index: {}, may-alias: {3,5,7}]   ;;  %s2719_s4 = inlined_call_operand.hbm [shape: bf16[128,128], index: 4, kind: input, shape index: {}]   ;;  %s2720_s5 = inlined_call_operand.vmem [shape: f32[1,128], index: 5, kind: input, shape index: {}, may-alias: {3,5,7}]   ;;  %s2721_s6 = inlined_call_operand.hbm [shape: bf16[128,128], index: 6, kind: input, shape index: {}]   ;;  %s2722_s7 = inlined_call_operand.vmem [shape: f32[1,128], index: 7, kind: input, shape index: {}, may-alias: {3,5,7}]   ;;  %s2723_s8 = inlined_call_operand.vmem [shape: f32[512,128], index: 8, kind: output, shape index: {}]  }
   0x1   :  { %14 = vsyncpa [#allocation5], 0  ;;  %s2392_s27 = smov 0  }
   0x2 LB: > { %s2398_s28 = sadd.s32 4294967295, %s2341_s27   ;;  %p1750_p0 = scmp.ge.s32.totalorder %s2341_s27, 1  ;;  %s2341_s27 = sphi %s2392_s27, %s20_s27  }
   0x3   : > { %p229_p1 = scmp.lt.s32.totalorder %s2341_s27, 3  ;;  %s2343_s29 = smov [#allocation2]  }
   0x4   : > { %s247_s30 = sshll.u32 %s2343_s29, 4  ;;  %p2724_p3 = scmp.eq.s32.totalorder %s2398_s28, 0  ;;  %s248_s30 = int_to_ptr.vmem [resolvable:$true] %s247_s30 }
   0x5   : > { %p2402_p2 = pnand %p1750_p0, %p229_p1  ;;  %s2344_s10 = smov [#allocation4]  }
   0x6   : > { %s263_s11 = sshll.u32 %s2344_s10, 4  ;;  %s2271_s15 = scalar_lea.hbm %s2719_s4, 1024  ;;  %s2415_s11 = int_to_ptr.vmem [resolvable:$true] %s263_s11 }
   0x7   : > { %s2726_s9 = scalar_select %p2402_p2, 1, 0 }
   0x8   : > { %p2167_p4 = pneg %p2402_p2  ;;  %p2272_p6 = scmp.ne.s32.totalorder %s2719_s4, %s2271_s15 }
   0x9   : > { %p2278_p10 = scmp.lt.u32.totalorder %s2271_s15, %s2719_s4 }
   0xa   : > { %p2411_p5 = pnand %p2724_p3, %p2167_p4 }
   0xc   : > { %p2273_p7 = pneg %p2411_p5 }
   0xe   : > { %p2274_p8 = pnand %p2273_p7, %p2272_p6 }
  0x10   : > { %p2275_p9 = pneg %p2274_p8 }
  0x12   : > { %p2280_p11 = pnand %p2278_p10, %p2275_p9 }
  0x14   : > { %2283 = shalt.err (!%p2280_p11)
}
  0x15   : > { %s2284_s20 = scalar_lea.vmem %s248_s30, 1024  ;;  %p2292_p1 = scmp.lt.s32.totalorder %s248_s30, %s248_s30 }
  0x16   : > { %p2285_p12 = scmp.ne.s32.totalorder %s248_s30, %s2284_s20  ;;  %p2293_p4 = scmp.lt.s32.totalorder %s2284_s20, %s2284_s20 }
  0x18   : > { %p2287_p13 = pnand %p2285_p12, %p2273_p7  ;;  %p2294_p3 = por %p2293_p4, %p2292_p1 }
  0x1a   : > { %p2288_p0 = pneg %p2287_p13 }
  0x1c   : > { %p2295_p2 = pnand %p2294_p3, %p2288_p0 }
  0x1e   : > { %2298 = shalt.err (!%p2295_p2)
}
  0x1f   : > { %s2345_s21 = smov 64   ;;  %s2346_s22 = smov 4  }
  0x20   : > { %2170 = dma.hbm_to_vmem [thread:$0]  (!%p2411_p5), %s2719_s4, 1024, %s248_s30, [#allocation3], %s2345_s21, %s2345_s21, %s2346_s22  }
  0x21   : > { %s2299_s29 = scalar_lea.hbm %s2721_s6, 1024 }
  0x22   : > { %p2300_p6 = scmp.ne.s32.totalorder %s2721_s6, %s2299_s29  ;;  %p2306_p8 = scmp.lt.u32.totalorder %s2299_s29, %s2721_s6 }
  0x24   : > { %p2302_p2 = pnand %p2300_p6, %p2273_p7 }
  0x26   : > { %p2303_p3 = pneg %p2302_p2 }
  0x28   : > { %p2308_p9 = pnand %p2306_p8, %p2303_p3 }
  0x2a   : > { %2311 = shalt.err (!%p2308_p9)
}
  0x2b   : > { %s2312_s30 = scalar_lea.vmem %s2415_s11, 1024  ;;  %p2320_p13 = scmp.lt.s32.totalorder %s2415_s11, %s2415_s11 }
  0x2c   : > { %p2313_p10 = scmp.ne.s32.totalorder %s2415_s11, %s2312_s30  ;;  %p2321_p0 = scmp.lt.s32.totalorder %s2312_s30, %s2312_s30 }
  0x2e   : > { %p2315_p11 = pnand %p2313_p10, %p2273_p7  ;;  %p2322_p1 = por %p2321_p0, %p2320_p13 }
  0x30   : > { %p2316_p12 = pneg %p2315_p11 }
  0x32   : > { %p2323_p4 = pnand %p2322_p1, %p2316_p12 }
  0x34   : > { %2326 = shalt.err (!%p2323_p4)
}
  0x35   : > { %2173 = dma.hbm_to_vmem [thread:$0]  (!%p2411_p5), %s2721_s6, 1024, %s2415_s11, [#allocation5], %s2345_s21, %s2345_s21, %s2346_s22  }
  0x36   : > { %p2728_p6 = scmp.ne.s32.totalorder %s2726_s9, 0 }
  0x37   : > { %p2729_p2 = scmp.eq.s32.totalorder (!%p2728_p6), %s2398_s28, 0 }
  0x38   : > { %299 = sbr.rel (%p2728_p6) target bundleno = 1139 (0x473), region = 52 }
  0x3f   : > { %2332 = dma.done.wait (%p2729_p2), [#allocation3], 1024   ;;  %p2730_p7 = pmov %p2729_p2 }
  0x40   : > { %p2731_p3 = pmov %p2729_p2 }
  0x41   : > { %2334 = vsyncadd (%p2730_p7), [#allocation3], 4294966272 }
  0x42   : > { %2336 = dma.done.wait (%p2731_p3), [#allocation5], 1024   ;;  %p2732_p8 = pmov %p2729_p2 }
  0x43   : > { %s1757_s12 = sshll.u32 %s2398_s28, 5  ;;  %v2190_v0 = vld [vmem:[%s2717_s2] sm:$0xff]   ;;  %vm519_vm0 = vcmask 130048   ;;  %v2208_v13 = vld [vmem:[#allocation2 + $0x8] sm:$0xff]   ;;  %v2209_v16 = vld [vmem:[#allocation2 + $0x10] sm:$0xff]   ;;  %p348_p5 = scmp.lt.s32.totalorder %s2398_s28, 1 }
  0x44   : > { %2338 = vsyncadd (%p2732_p8), [#allocation5], 4294966272  ;;  %p343_p9 = scmp.lt.s32.totalorder %s1757_s12, 63  ;;  %2027 = vmatprep.subr.bf16.mxu0 %v2190_v0  ;;  %2157 = vmatprep.subr.bf16.mxu1 %v2190_v0  ;;  %v2207_v12 = vld [vmem:[#allocation2] sm:$0xff]   ;;  %v2210_v19 = vld [vmem:[#allocation2 + $0x18] sm:$0xff]  }
  0x45   : > { %2028 = vmatpush3.bf16.msra.mxu0 %v2190_v0  ;;  %2158 = vmatpush3.bf16.msra.mxu1 %v2190_v0  ;;  %v2211_v20 = vld [vmem:[#allocation2 + $0x20] sm:$0xff]   ;;  %v2212_v22 = vld [vmem:[#allocation2 + $0x28] sm:$0xff]   ;;  %v2213_v23 = vld [vmem:[#allocation2 + $0x30] sm:$0xff]   ;;  %s2736_s28 = smov (!%p348_p5, %s2398_s28), 1 }
  0x46   : > { %s2734_s12 = smov (!%p343_p9, %s1757_s12), 63  ;;  %2061 = vmatprep.subr.bf16.mxu1 %v2207_v12  ;;  %v2214_v24 = vld [vmem:[#allocation2 + $0x38] sm:$0xff]   ;;  %v2521_v25 = vld [vmem:[%s2718_s3] ss:$0 sm:$0xff]  ;;  %s1849_s24 = sshll.u32 %s2736_s28, 8 }
  0x47   : > { %s1758_s9 = sshll.u32 %s2734_s12, 2  ;;  %s2566_s29 = scalar_lea.vmem %s2716_s1, %s1849_s24 }
  0x48   : > { %s2481_s19 = scalar_lea.vmem %s2715_s0, %s1758_s9  ;;  %s1762_s13 = sshll.u32 %s2734_s12, 3 }
  0x49   : > { %v2191_v1 = vld [vmem:[%s2481_s19] sm:$0xff]   ;;  %v2192_v2 = vld [vmem:[%s2481_s19 + $0x8] sm:$0xff]   ;;  %v2193_v3 = vld [vmem:[%s2481_s19 + $0x10] sm:$0xff]   ;;  %s2646_s17 = scalar_lea.vmem %s2723_s8, %s1762_s13 }
  0x4a   : > { %2029 = vmatprep.mubr.msk.bf16.mxu0 %vm519_vm0, %v2191_v1  ;;  %v2194_v4 = vld [vmem:[%s2481_s19 + $0x18] sm:$0xff]   ;;  %v2195_v5 = vld [vmem:[%s2481_s19 + $0x20] sm:$0xff]   ;;  %v2200_v7 = vld [vmem:[%s2481_s19 + $0x48] sm:$0xff]  }
  0x4b   : > { %2030 = vmatmul.mubr.msk.bf16.vlgmr.msra.gmra.mrb[0].mxu0 %vm519_vm0, %v2192_v2  ;;  %v2199_v6 = vld [vmem:[%s2481_s19 + $0x40] sm:$0xff]   ;;  %v2201_v8 = vld [vmem:[%s2481_s19 + $0x50] sm:$0xff]   ;;  %v2202_v9 = vld [vmem:[%s2481_s19 + $0x58] sm:$0xff]  }
  0x4c   : > { %2033 = vmatprep.mubr.msk.bf16.mxu0 %vm519_vm0, %v2193_v3  ;;  %2045 = vmatprep.mubr.msk.bf16.mxu1 %vm519_vm0, %v2199_v6  ;;  %v2196_v10 = vld [vmem:[%s2481_s19 + $0x28] sm:$0xff]   ;;  %v2203_v11 = vld [vmem:[%s2481_s19 + $0x60] sm:$0xff]   ;;  %v2197_v14 = vld [vmem:[%s2481_s19 + $0x30] sm:$0xff]  }
  0x4d   : > { %2046 = vmatmul.mubr.msk.bf16.vlgmr.msra.gmra.mrb[0].mxu1 %vm519_vm0, %v2200_v7  ;;  %v2204_v15 = vld [vmem:[%s2481_s19 + $0x68] sm:$0xff]   ;;  %v2205_v17 = vld [vmem:[%s2481_s19 + $0x70] sm:$0xff]   ;;  %v2198_v18 = vld [vmem:[%s2481_s19 + $0x38] sm:$0xff]  }
  0x4e   : > { %2049 = vmatprep.mubr.msk.bf16.mxu1 %vm519_vm0, %v2201_v8  ;;  %2062 = vmatpush3.bf16.msra.mxu1 %v2207_v12  ;;  %v2206_v21 = vld [vmem:[%s2481_s19 + $0x78] sm:$0xff]  }
  0x4f   : > { %2063 = vmatprep.subr.bf16.mxu1 %v2208_v13 }
  0x52   : > { %2064 = vmatpush3.bf16.msra.mxu1 %v2208_v13 }
  0x53   : > { %2034 = vmatmul.mubr.msk.bf16.gmra.mrb[4].mxu0 %vm519_vm0, %v2194_v4  ;;  %2065 = vmatprep.subr.bf16.mxu1 %v2209_v16 }
  0x54   : > { %2037 = vmatprep.mubr.msk.bf16.mxu0 %vm519_vm0, %v2195_v5 }
  0x55   : > { %2050 = vmatmul.mubr.msk.bf16.gmra.mrb[4].mxu1 %vm519_vm0, %v2202_v9 }
  0x56   : > { %2053 = vmatprep.mubr.msk.bf16.mxu1 %vm519_vm0, %v2203_v11  ;;  %2066 = vmatpush3.bf16.msra.mxu1 %v2209_v16 }
  0x57   : > { %2067 = vmatprep.subr.bf16.mxu1 %v2210_v19 }
  0x5a   : > { %2068 = vmatpush3.bf16.msra.mxu1 %v2210_v19 }
  0x5b   : > { %2038 = vmatmul.mubr.msk.bf16.gmra.mrb[8].mxu0 %vm519_vm0, %v2196_v10  ;;  %2069 = vmatprep.subr.bf16.mxu1 %v2211_v20 }
  0x5c   : > { %2041 = vmatprep.mubr.msk.bf16.mxu0 %vm519_vm0, %v2197_v14 }
  0x5d   : > { %2054 = vmatmul.mubr.msk.bf16.gmra.mrb[8].mxu1 %vm519_vm0, %v2204_v15 }
  0x5e   : > { %2057 = vmatprep.mubr.msk.bf16.mxu1 %vm519_vm0, %v2205_v17  ;;  %2070 = vmatpush3.bf16.msra.mxu1 %v2211_v20 }
  0x5f   : > { %2071 = vmatprep.subr.bf16.mxu1 %v2212_v22 }
  0x62   : > { %2072 = vmatpush3.bf16.msra.mxu1 %v2212_v22 }
  0x63   : > { %2042 = vmatmul.mubr.msk.bf16.gmra.mrb[12].mxu0 %vm519_vm0, %v2198_v18  ;;  %2073 = vmatprep.subr.bf16.mxu1 %v2213_v23 }
  0x65   : > { %2058 = vmatmul.mubr.msk.bf16.gmra.mrb[12].mxu1 %vm519_vm0, %v2206_v21 }
  0x66   : > { %2074 = vmatpush3.bf16.msra.mxu1 %v2213_v23 }
  0x67   : > { %2075 = vmatprep.subr.bf16.mxu1 %v2214_v24 }
  0x6a   : > { %2076 = vmatpush3.bf16.msra.mxu1 %v2214_v24 }
 0x11e   : > { %v2031_v26 = vpop.f32.mrb[0].mxu0 }
 0x11f   : > { %v611_v27 = vadd.f32 %v2031_v26, %v2521_v25  ;;  %v602_v28 = vpop.f32.mrb[1].mxu0 }
 0x120   : > { %v603_v29 = vadd.f32 %v2521_v25, %v602_v28  ;;  %v2032_v30 = vpop.f32.mrb[2].mxu0  ;;  %v2047_v38 = vpop.f32.mrb[0].mxu1 }
 0x121   : > { %v614_v31 = vadd.f32 %v2032_v30, %v2521_v25  ;;  %v605_v32 = vpop.f32.mrb[3].mxu0  ;;  %v731_v34 = vmax.f32 %v611_v27, 0.0  ;;  %v675_v40 = vadd.f32 %v2047_v38, %v2521_v25  ;;  %v666_v41 = vpop.f32.mrb[1].mxu1 }
 0x122   : > { %v606_v33 = vadd.f32 %v2521_v25, %v605_v32  ;;  %v729_v36 = vmax.f32 %v603_v29, 0.0  ;;  %v667_v44 = vadd.f32 %v2521_v25, %v666_v41  ;;  %v2048_v45 = vpop.f32.mrb[2].mxu1 }
 0x123   : > { %v732_v35 = vmax.f32 %v614_v31, 0.0  ;;  %v747_v48 = vmax.f32 %v675_v40, 0.0  ;;  %v678_v49 = vadd.f32 %v2048_v45, %v2521_v25  ;;  %v669_v50 = vpop.f32.mrb[3].mxu1 }
 0x124   : > { %v730_v37 = vmax.f32 %v606_v33, 0.0  ;;  %v745_v53 = vmax.f32 %v667_v44, 0.0  ;;  %v670_v54 = vadd.f32 %v2521_v25, %v669_v50 }
 0x125   : > { %v762_v39 = vpack.c.bf16 %v732_v35, %v731_v34  ;;  %v748_v57 = vmax.f32 %v678_v49, 0.0 }
 0x126   : > { %v761_v42 = vpack.c.bf16 %v730_v37, %v729_v36  ;;  %v2035_v43 = vpop.f32.mrb[4].mxu0  ;;  %v746_v59 = vmax.f32 %v670_v54, 0.0 }
 0x127   : > { %v627_v46 = vadd.f32 %v2035_v43, %v2521_v25  ;;  %v618_v47 = vpop.f32.mrb[5].mxu0  ;;  %v2535_v62 = vpack.c.bf16 %v748_v57, %v747_v48 }
 0x128   : > { %v619_v51 = vadd.f32 %v2521_v25, %v618_v47  ;;  %v2036_v52 = vpop.f32.mrb[6].mxu0  ;;  %2077 = vmatprep.mubr.bf16.mxu1 %v761_v42  ;;  %v2537_v1 = vpack.c.bf16 %v746_v59, %v745_v53  ;;  %v2051_v2 = vpop.f32.mrb[4].mxu1 }
 0x129   : > { %v630_v55 = vadd.f32 %v2036_v52, %v2521_v25  ;;  %v621_v56 = vpop.f32.mrb[7].mxu0  ;;  %2078 = vmatmul.mubr.bf16.vlgmr.msra.gmra.mrb[16].mxu1 %v762_v39  ;;  %v735_v60 = vmax.f32 %v627_v46, 0.0  ;;  %v691_v4 = vadd.f32 %v2051_v2, %v2521_v25  ;;  %v682_v5 = vpop.f32.mrb[5].mxu1 }
 0x12a   : > { %v622_v58 = vadd.f32 %v2521_v25, %v621_v56  ;;  %v733_v63 = vmax.f32 %v619_v51, 0.0  ;;  %v683_v8 = vadd.f32 %v2521_v25, %v682_v5  ;;  %v2052_v9 = vpop.f32.mrb[6].mxu1 }
 0x12b   : > { %v736_v61 = vmax.f32 %v630_v55, 0.0  ;;  %v751_v12 = vmax.f32 %v691_v4, 0.0  ;;  %v694_v13 = vadd.f32 %v2052_v9, %v2521_v25  ;;  %v685_v14 = vpop.f32.mrb[7].mxu1 }
 0x12c   : > { %v734_v0 = vmax.f32 %v622_v58, 0.0  ;;  %v749_v17 = vmax.f32 %v683_v8, 0.0  ;;  %v686_v18 = vadd.f32 %v2521_v25, %v685_v14 }
 0x12d   : > { %v764_v3 = vpack.c.bf16 %v736_v61, %v735_v60  ;;  %v752_v21 = vmax.f32 %v694_v13, 0.0 }
 0x12e   : > { %v763_v6 = vpack.c.bf16 %v734_v0, %v733_v63  ;;  %v2039_v7 = vpop.f32.mrb[8].mxu0  ;;  %v750_v23 = vmax.f32 %v686_v18, 0.0 }
 0x12f   : > { %v643_v10 = vadd.f32 %v2039_v7, %v2521_v25  ;;  %v634_v11 = vpop.f32.mrb[9].mxu0  ;;  %v772_v27 = vpack.c.bf16 %v752_v21, %v751_v12 }
 0x130   : > { %v635_v15 = vadd.f32 %v2521_v25, %v634_v11  ;;  %v2040_v16 = vpop.f32.mrb[10].mxu0  ;;  %2081 = vmatprep.mubr.bf16.mxu1 %v763_v6  ;;  %v771_v30 = vpack.c.bf16 %v750_v23, %v749_v17  ;;  %v2055_v31 = vpop.f32.mrb[8].mxu1 }
 0x131   : > { %v646_v19 = vadd.f32 %v2040_v16, %v2521_v25  ;;  %v637_v20 = vpop.f32.mrb[11].mxu0  ;;  %2082 = vmatmul.mubr.bf16.gmra.mrb[20].mxu1 %v764_v3  ;;  %v739_v24 = vmax.f32 %v643_v10, 0.0  ;;  %v707_v33 = vadd.f32 %v2055_v31, %v2521_v25  ;;  %v698_v34 = vpop.f32.mrb[9].mxu1 }
 0x132   : > { %v638_v22 = vadd.f32 %v2521_v25, %v637_v20  ;;  %v737_v28 = vmax.f32 %v635_v15, 0.0  ;;  %v699_v37 = vadd.f32 %v2521_v25, %v698_v34  ;;  %v2056_v38 = vpop.f32.mrb[10].mxu1 }
 0x133   : > { %v740_v26 = vmax.f32 %v646_v19, 0.0  ;;  %v755_v41 = vmax.f32 %v707_v33, 0.0  ;;  %v710_v42 = vadd.f32 %v2056_v38, %v2521_v25  ;;  %v701_v43 = vpop.f32.mrb[11].mxu1 }
 0x134   : > { %v738_v29 = vmax.f32 %v638_v22, 0.0  ;;  %v753_v46 = vmax.f32 %v699_v37, 0.0  ;;  %v702_v47 = vadd.f32 %v2521_v25, %v701_v43 }
 0x135   : > { %v766_v32 = vpack.c.bf16 %v740_v26, %v739_v24  ;;  %v756_v50 = vmax.f32 %v710_v42, 0.0 }
 0x136   : > { %v765_v35 = vpack.c.bf16 %v738_v29, %v737_v28  ;;  %v2043_v36 = vpop.f32.mrb[12].mxu0  ;;  %v754_v52 = vmax.f32 %v702_v47, 0.0 }
 0x137   : > { %v659_v39 = vadd.f32 %v2043_v36, %v2521_v25  ;;  %v650_v40 = vpop.f32.mrb[13].mxu0  ;;  %v774_v55 = vpack.c.bf16 %v756_v50, %v755_v41 }
 0x138   : > { %v651_v44 = vadd.f32 %v2521_v25, %v650_v40  ;;  %v2044_v45 = vpop.f32.mrb[14].mxu0  ;;  %2085 = vmatprep.mubr.bf16.mxu1 %v765_v35  ;;  %v773_v58 = vpack.c.bf16 %v754_v52, %v753_v46  ;;  %v2059_v59 = vpop.f32.mrb[12].mxu1 }
 0x139   : > { %v662_v48 = vadd.f32 %v2044_v45, %v2521_v25  ;;  %v653_v49 = vpop.f32.mrb[15].mxu0  ;;  %2086 = vmatmul.mubr.bf16.gmra.mrb[24].mxu1 %v766_v32  ;;  %v743_v53 = vmax.f32 %v659_v39, 0.0  ;;  %v723_v61 = vadd.f32 %v2059_v59, %v2521_v25  ;;  %v714_v63 = vpop.f32.mrb[13].mxu1 }
 0x13a   : > { %v654_v51 = vadd.f32 %v2521_v25, %v653_v49  ;;  %v741_v56 = vmax.f32 %v651_v44, 0.0  ;;  %v715_v2 = vadd.f32 %v2521_v25, %v714_v63  ;;  %v2060_v3 = vpop.f32.mrb[14].mxu1  ;;  %v2215_v63 = vld [vmem:[%s2566_s29] ss:$8 sps:$4 sm:$0xff]  }
 0x13b   : > { %v744_v54 = vmax.f32 %v662_v48, 0.0  ;;  %v759_v4 = vmax.f32 %v723_v61, 0.0  ;;  %v726_v5 = vadd.f32 %v2060_v3, %v2521_v25  ;;  %v717_v6 = vpop.f32.mrb[15].mxu1  ;;  %v2264_v61 = vld [vmem:[#allocation4 + $0x8] sm:$0xff]   ;;  %v2220_v3 = vld [vmem:[%s2566_s29 + $0x10] ss:$8 sps:$4 sm:$0xff]  }
 0x13c   : > { %v742_v57 = vmax.f32 %v654_v51, 0.0  ;;  %v757_v7 = vmax.f32 %v715_v2, 0.0  ;;  %v718_v8 = vadd.f32 %v2521_v25, %v717_v6  ;;  %v2217_v25 = vld [vmem:[%s2566_s29 + $0x4] ss:$8 sps:$4 sm:$0xff]   ;;  %v2218_v2 = vld [vmem:[%s2566_s29 + $0x14] ss:$8 sps:$4 sm:$0xff]  }
 0x13d   : > { %v768_v60 = vpack.c.bf16 %v744_v54, %v743_v53  ;;  %v760_v9 = vmax.f32 %v726_v5, 0.0  ;;  %1217 = vmatprep.mubr.bf16.mxu0 %v2217_v25  ;;  %v2223_v5 = vld [vmem:[%s2566_s29 + $0x20] ss:$8 sps:$4 sm:$0xff]   ;;  %v2224_v6 = vld [vmem:[%s2566_s29 + $0x34] ss:$8 sps:$4 sm:$0xff]  }
 0x13e   : > { %v767_v0 = vpack.c.bf16 %v742_v57, %v741_v56  ;;  %v758_v10 = vmax.f32 %v718_v8, 0.0  ;;  %v2227_v8 = vld [vmem:[%s2566_s29 + $0x44] ss:$8 sps:$4 sm:$0xff]   ;;  %v2235_v25 = vld [vmem:[%s2566_s29 + $0x60] ss:$8 sps:$4 sm:$0xff]  }
 0x13f   : > { %v776_v11 = vpack.c.bf16 %v760_v9, %v759_v4  ;;  %v2221_v4 = vld [vmem:[%s2566_s29 + $0x24] ss:$8 sps:$4 sm:$0xff]   ;;  %v2229_v9 = vld [vmem:[%s2566_s29 + $0x40] ss:$8 sps:$4 sm:$0xff]  }
 0x140   : > { %2089 = vmatprep.mubr.bf16.mxu1 %v767_v0  ;;  %v775_v12 = vpack.c.bf16 %v758_v10, %v757_v7  ;;  %v2265_v0 = vld [vmem:[#allocation4 + $0x10] sm:$0xff]  }
 0x141   : > { %2090 = vmatmul.mubr.bf16.gmra.mrb[28].mxu1 %v768_v60  ;;  %v2263_v60 = vld [vmem:[#allocation4] sm:$0xff]   ;;  %v2226_v7 = vld [vmem:[%s2566_s29 + $0x30] ss:$8 sps:$4 sm:$0xff]   ;;  %v2230_v10 = vld [vmem:[%s2566_s29 + $0x54] ss:$8 sps:$4 sm:$0xff]  }
 0x142   : > { %2093 = vmatprep.mubr.bf16.mxu1 %v2537_v1  ;;  %2109 = vmatprep.subr.bf16.mxu1 %v2263_v60 }
 0x143   : > { %2110 = vmatpush3.bf16.msra.mxu1 %v2263_v60 }
 0x144   : > { %2111 = vmatprep.subr.bf16.mxu1 %v2264_v61 }
 0x147   : > { %2112 = vmatpush3.bf16.msra.mxu1 %v2264_v61 }
 0x148   : > { %2113 = vmatprep.subr.bf16.mxu1 %v2265_v0 }
 0x149   : > { %2094 = vmatmul.mubr.bf16.gmra.mrb[32].mxu1 %v2535_v62 }
 0x14a   : > { %2097 = vmatprep.mubr.bf16.mxu1 %v771_v30 }
 0x14b   : > { %2114 = vmatpush3.bf16.msra.mxu1 %v2265_v0 }
 0x151   : > { %2098 = vmatmul.mubr.bf16.gmra.mrb[36].mxu1 %v772_v27 }
 0x152   : > { %2101 = vmatprep.mubr.bf16.mxu1 %v773_v58 }
 0x159   : > { %2102 = vmatmul.mubr.bf16.gmra.mrb[40].mxu1 %v774_v55 }
 0x15a   : > { %2105 = vmatprep.mubr.bf16.mxu1 %v775_v12  ;;  %v2233_v12 = vld [vmem:[%s2566_s29 + $0x64] ss:$8 sps:$4 sm:$0xff]  }
 0x161   : > { %2106 = vmatmul.mubr.bf16.gmra.mrb[44].mxu1 %v776_v11  ;;  %v2232_v11 = vld [vmem:[%s2566_s29 + $0x50] ss:$8 sps:$4 sm:$0xff]  }
 0x1fc   : > { %v2079_v1 = vpop.f32.mrb[16].mxu1 }
 0x1fd   : > { %v875_v13 = vpop.f32.mrb[17].mxu1 }
 0x1fe   : > { %v2080_v62 = vpop.f32.mrb[18].mxu1 }
 0x1ff   : > { %v1003_v14 = vpack.c.bf16 %v2080_v62, %v2079_v1  ;;  %v878_v15 = vpop.f32.mrb[19].mxu1  ;;  %v2236_v1 = vld [vmem:[%s2566_s29 + $0x74] ss:$8 sps:$4 sm:$0xff]   ;;  %v2239_v62 = vld [vmem:[%s2566_s29 + $0x84] ss:$8 sps:$4 sm:$0xff]  }
 0x200   : > { %v1002_v16 = vpack.c.bf16 %v878_v15, %v875_v13  ;;  %v2238_v13 = vld [vmem:[%s2566_s29 + $0x70] ss:$8 sps:$4 sm:$0xff]   ;;  %v2242_v15 = vld [vmem:[%s2566_s29 + $0x94] ss:$8 sps:$4 sm:$0xff]  }
 0x204   : > { %v2083_v17 = vpop.f32.mrb[20].mxu1 }
 0x205   : > { %v891_v18 = vpop.f32.mrb[21].mxu1 }
 0x206   : > { %v2084_v19 = vpop.f32.mrb[22].mxu1 }
 0x207   : > { %v1005_v20 = vpack.c.bf16 %v2084_v19, %v2083_v17  ;;  %v894_v21 = vpop.f32.mrb[23].mxu1  ;;  %v2245_v17 = vld [vmem:[%s2566_s29 + $0xa4] ss:$8 sps:$4 sm:$0xff]   ;;  %v2248_v19 = vld [vmem:[%s2566_s29 + $0xb4] ss:$8 sps:$4 sm:$0xff]  }
 0x208   : > { %v1004_v22 = vpack.c.bf16 %v894_v21, %v891_v18  ;;  %v2247_v18 = vld [vmem:[%s2566_s29 + $0xa0] ss:$8 sps:$4 sm:$0xff]   ;;  %v2250_v21 = vld [vmem:[%s2566_s29 + $0xb0] ss:$8 sps:$4 sm:$0xff]  }
 0x20c   : > { %v2087_v23 = vpop.f32.mrb[24].mxu1 }
 0x20d   : > { %v907_v24 = vpop.f32.mrb[25].mxu1 }
 0x20e   : > { %v2088_v26 = vpop.f32.mrb[26].mxu1 }
 0x20f   : > { %v1007_v27 = vpack.c.bf16 %v2088_v26, %v2087_v23  ;;  %v910_v28 = vpop.f32.mrb[27].mxu1  ;;  %v2267_v23 = vld [vmem:[#allocation4 + $0x20] sm:$0xff]  }
 0x210   : > { %v1006_v29 = vpack.c.bf16 %v910_v28, %v907_v24  ;;  %v2268_v24 = vld [vmem:[#allocation4 + $0x28] sm:$0xff]   ;;  %v2269_v28 = vld [vmem:[#allocation4 + $0x30] sm:$0xff]  }
 0x211   : > { %v2253_v26 = vld [vmem:[%s2566_s29 + $0xc0] ss:$8 sps:$4 sm:$0xff]  }
 0x214   : > { %v2091_v30 = vpop.f32.mrb[28].mxu1 }
 0x215   : > { %v923_v31 = vpop.f32.mrb[29].mxu1 }
 0x216   : > { %v2092_v32 = vpop.f32.mrb[30].mxu1 }
 0x217   : > { %v1009_v33 = vpack.c.bf16 %v2092_v32, %v2091_v30  ;;  %v926_v34 = vpop.f32.mrb[31].mxu1  ;;  %v2256_v30 = vld [vmem:[%s2566_s29 + $0xd0] ss:$8 sps:$4 sm:$0xff]   ;;  %v2259_v32 = vld [vmem:[%s2566_s29 + $0xe0] ss:$8 sps:$4 sm:$0xff]  }
 0x218   : > { %v1008_v35 = vpack.c.bf16 %v926_v34, %v923_v31  ;;  %v2257_v31 = vld [vmem:[%s2566_s29 + $0xe4] ss:$8 sps:$4 sm:$0xff]   ;;  %v2262_v34 = vld [vmem:[%s2566_s29 + $0xf0] ss:$8 sps:$4 sm:$0xff]  }
 0x21c   : > { %v2095_v36 = vpop.f32.mrb[32].mxu1 }
 0x21d   : > { %v939_v37 = vpop.f32.mrb[33].mxu1 }
 0x21e   : > { %v2096_v38 = vpop.f32.mrb[34].mxu1 }
 0x21f   : > { %v1011_v39 = vpack.c.bf16 %v2096_v38, %v2095_v36  ;;  %v942_v40 = vpop.f32.mrb[35].mxu1  ;;  %v2603_v36 = vld [vmem:[%s2720_s5] ss:$0 sm:$0xff] }
 0x220   : > { %v1010_v41 = vpack.c.bf16 %v942_v40, %v939_v37 }
 0x222   : > { %1891 = vmatprep.subr.bf16.mxu0 %v1010_v41 }
 0x223   : > { %1892 = vmatpush3.bf16.msra.mxu0 %v1002_v16  ;;  %v2244_v16 = vld [vmem:[%s2566_s29 + $0x90] ss:$8 sps:$4 sm:$0xff]  }
 0x224   : > { %v2099_v42 = vpop.f32.mrb[36].mxu1  ;;  %1893 = vmatprep.subr.bf16.mxu0 %v1011_v39 }
 0x225   : > { %v955_v43 = vpop.f32.mrb[37].mxu1 }
 0x226   : > { %v2100_v44 = vpop.f32.mrb[38].mxu1 }
 0x227   : > { %v1013_v45 = vpack.c.bf16 %v2100_v44, %v2099_v42  ;;  %v958_v46 = vpop.f32.mrb[39].mxu1  ;;  %1894 = vmatpush3.bf16.msra.mxu0 %v1003_v14  ;;  %v2241_v14 = vld [vmem:[%s2566_s29 + $0x80] ss:$8 sps:$4 sm:$0xff]  }
 0x228   : > { %v1012_v47 = vpack.c.bf16 %v958_v46, %v955_v43 }
 0x22a   : > { %1895 = vmatprep.subr.bf16.mxu0 %v1012_v47 }
 0x22b   : > { %1896 = vmatpush3.bf16.msra.mxu0 %v1004_v22  ;;  %v2251_v22 = vld [vmem:[%s2566_s29 + $0xc4] ss:$8 sps:$4 sm:$0xff]  }
 0x22c   : > { %v2103_v48 = vpop.f32.mrb[40].mxu1  ;;  %1897 = vmatprep.subr.bf16.mxu0 %v1013_v45 }
 0x22d   : > { %v971_v49 = vpop.f32.mrb[41].mxu1 }
 0x22e   : > { %v2104_v50 = vpop.f32.mrb[42].mxu1 }
 0x22f   : > { %v1015_v51 = vpack.c.bf16 %v2104_v50, %v2103_v48  ;;  %v974_v52 = vpop.f32.mrb[43].mxu1  ;;  %1898 = vmatpush3.bf16.msra.mxu0 %v1005_v20  ;;  %v2266_v20 = vld [vmem:[#allocation4 + $0x18] sm:$0xff]  }
 0x230   : > { %v1014_v53 = vpack.c.bf16 %v974_v52, %v971_v49  ;;  %2115 = vmatprep.subr.bf16.mxu1 %v2266_v20 }
 0x231   : > { %2116 = vmatpush3.bf16.msra.mxu1 %v2266_v20 }
 0x232   : > { %1899 = vmatprep.subr.bf16.mxu0 %v1014_v53  ;;  %2117 = vmatprep.subr.bf16.mxu1 %v2267_v23 }
 0x233   : > { %1900 = vmatpush3.bf16.msra.mxu0 %v1006_v29  ;;  %v2270_v29 = vld [vmem:[#allocation4 + $0x38] sm:$0xff]  }
 0x234   : > { %v2107_v54 = vpop.f32.mrb[44].mxu1  ;;  %1901 = vmatprep.subr.bf16.mxu0 %v1015_v51 }
 0x235   : > { %v987_v55 = vpop.f32.mrb[45].mxu1  ;;  %2118 = vmatpush3.bf16.msra.mxu1 %v2267_v23 }
 0x236   : > { %v2108_v56 = vpop.f32.mrb[46].mxu1  ;;  %2119 = vmatprep.subr.bf16.mxu1 %v2268_v24 }
 0x237   : > { %v1017_v57 = vpack.c.bf16 %v2108_v56, %v2107_v54  ;;  %v990_v58 = vpop.f32.mrb[47].mxu1  ;;  %1902 = vmatpush3.bf16.msra.mxu0 %v1007_v27  ;;  %v2254_v27 = vld [vmem:[%s2566_s29 + $0xd4] ss:$8 sps:$4 sm:$0xff]  }
 0x238   : > { %v1016_v59 = vpack.c.bf16 %v990_v58, %v987_v55 }
 0x239   : > { %2120 = vmatpush3.bf16.msra.mxu1 %v2268_v24 }
 0x23a   : > { %1903 = vmatprep.subr.bf16.mxu0 %v1016_v59  ;;  %2121 = vmatprep.subr.bf16.mxu1 %v2269_v28 }
 0x23b   : > { %1904 = vmatpush3.bf16.msra.mxu0 %v1008_v35 }
 0x23c   : > { %1905 = vmatprep.subr.bf16.mxu0 %v1017_v57 }
 0x23d   : > { %2122 = vmatpush3.bf16.msra.mxu1 %v2269_v28 }
 0x23e   : > { %2123 = vmatprep.subr.bf16.mxu1 %v2270_v29 }
 0x23f   : > { %1906 = vmatpush3.bf16.msra.mxu0 %v1009_v33  ;;  %v2260_v33 = vld [vmem:[%s2566_s29 + $0xf4] ss:$8 sps:$4 sm:$0xff]  }
 0x241   : > { %2124 = vmatpush3.bf16.msra.mxu1 %v2270_v29 }
 0x242   : > { %1218 = vmatmul.mubr.bf16.vlgmr.msra.gmra.mrb[16].mxu0 %v2215_v63 }
 0x243   : > { %1225 = vmatprep.mubr.bf16.mxu0 %v2218_v2 }
 0x24a   : > { %1226 = vmatmul.mubr.bf16.gmra.mrb[20].mxu0 %v2220_v3 }
 0x24b   : > { %1233 = vmatprep.mubr.bf16.mxu0 %v2221_v4 }
 0x252   : > { %1234 = vmatmul.mubr.bf16.gmra.mrb[24].mxu0 %v2223_v5 }
 0x253   : > { %1241 = vmatprep.mubr.bf16.mxu0 %v2224_v6 }
 0x25a   : > { %1242 = vmatmul.mubr.bf16.gmra.mrb[28].mxu0 %v2226_v7 }
 0x25b   : > { %1249 = vmatprep.mubr.bf16.mxu0 %v2227_v8 }
 0x262   : > { %1250 = vmatmul.mubr.bf16.gmra.mrb[32].mxu0 %v2229_v9 }
 0x263   : > { %1257 = vmatprep.mubr.bf16.mxu0 %v2230_v10 }
 0x26a   : > { %1258 = vmatmul.mubr.bf16.gmra.mrb[36].mxu0 %v2232_v11 }
 0x26b   : > { %1265 = vmatprep.mubr.bf16.mxu0 %v2233_v12 }
 0x272   : > { %1266 = vmatmul.mubr.bf16.gmra.mrb[40].mxu0 %v2235_v25 }
 0x273   : > { %1273 = vmatprep.mubr.bf16.mxu0 %v2236_v1 }
 0x27a   : > { %1274 = vmatmul.mubr.bf16.gmra.mrb[44].mxu0 %v2238_v13 }
 0x27b   : > { %1281 = vmatprep.mubr.bf16.mxu0 %v2239_v62 }
 0x282   : > { %1282 = vmatmul.mubr.bf16.gmra.mrb[48].mxu0 %v2241_v14 }
 0x283   : > { %1289 = vmatprep.mubr.bf16.mxu0 %v2242_v15 }
 0x28a   : > { %1290 = vmatmul.mubr.bf16.gmra.mrb[52].mxu0 %v2244_v16 }
 0x28b   : > { %1297 = vmatprep.mubr.bf16.mxu0 %v2245_v17 }
 0x292   : > { %1298 = vmatmul.mubr.bf16.gmra.mrb[56].mxu0 %v2247_v18 }
 0x293   : > { %1305 = vmatprep.mubr.bf16.mxu0 %v2248_v19 }
 0x29a   : > { %1306 = vmatmul.mubr.bf16.gmra.mrb[60].mxu0 %v2250_v21 }
 0x29b   : > { %1313 = vmatprep.mubr.bf16.mxu0 %v2251_v22 }
 0x2a2   : > { %1314 = vmatmul.mubr.bf16.gmra.mrb[64].mxu0 %v2253_v26 }
 0x2a3   : > { %1321 = vmatprep.mubr.bf16.mxu0 %v2254_v27 }
 0x2aa   : > { %1322 = vmatmul.mubr.bf16.gmra.mrb[68].mxu0 %v2256_v30 }
 0x2ab   : > { %1329 = vmatprep.mubr.bf16.mxu0 %v2257_v31 }
 0x2b2   : > { %1330 = vmatmul.mubr.bf16.gmra.mrb[72].mxu0 %v2259_v32 }
 0x2b3   : > { %1337 = vmatprep.mubr.bf16.mxu0 %v2260_v33 }
 0x2ba   : > { %1338 = vmatmul.mubr.bf16.gmra.mrb[76].mxu0 %v2262_v34 }
 0x315   : > { %v1907_v35 = vpop.f32.mrb[16].mxu0 }
 0x316   : > { %v1908_v37 = vpop.f32.mrb[17].mxu0 }
 0x317   : > { %v1909_v38 = vadd.f32 %v1908_v37, %v1907_v35  ;;  %v1910_v39 = vpop.f32.mrb[18].mxu0 }
 0x318   : > { %v1911_v40 = vpop.f32.mrb[19].mxu0 }
 0x319   : > { %v1220_v41 = vadd.f32 %v1909_v38, %v2603_v36  ;;  %v1912_v42 = vadd.f32 %v1911_v40, %v1910_v39 }
 0x31b   : > { %v1223_v43 = vadd.f32 %v1912_v42, %v2603_v36  ;;  %v1346_v44 = vmax.f32 %v1220_v41, 0.0 }
 0x31d   : > { %v1347_v45 = vmax.f32 %v1223_v43, 0.0  ;;  %v1913_v46 = vpop.f32.mrb[20].mxu0 }
 0x31e   : > { %v1914_v47 = vpop.f32.mrb[21].mxu0 }
 0x31f   : > { %v1915_v48 = vadd.f32 %v1914_v47, %v1913_v46  ;;  %v1916_v49 = vpop.f32.mrb[22].mxu0  ;;  %v1378_v50 = vpack.c.bf16 %v1347_v45, %v1346_v44 }
 0x320   : > { %v1917_v51 = vpop.f32.mrb[23].mxu0 }
 0x321   : > { %v1228_v52 = vadd.f32 %v1915_v48, %v2603_v36  ;;  %v1918_v53 = vadd.f32 %v1917_v51, %v1916_v49  ;;  %2125 = vmatprep.mubr.bf16.mxu1 %v1378_v50 }
 0x323   : > { %v1231_v54 = vadd.f32 %v1918_v53, %v2603_v36  ;;  %v1348_v55 = vmax.f32 %v1228_v52, 0.0 }
 0x325   : > { %v1349_v56 = vmax.f32 %v1231_v54, 0.0  ;;  %v1919_v57 = vpop.f32.mrb[24].mxu0 }
 0x326   : > { %v1920_v58 = vpop.f32.mrb[25].mxu0 }
 0x327   : > { %v1379_v59 = vpack.c.bf16 %v1349_v56, %v1348_v55  ;;  %v1921_v60 = vadd.f32 %v1920_v58, %v1919_v57  ;;  %v1922_v61 = vpop.f32.mrb[26].mxu0 }
 0x328   : > { %v1923_v63 = vpop.f32.mrb[27].mxu0 }
 0x329   : > { %v1236_v0 = vadd.f32 %v1921_v60, %v2603_v36  ;;  %v1924_v2 = vadd.f32 %v1923_v63, %v1922_v61  ;;  %2126 = vmatmul.mubr.bf16.vlgmr.msra.gmra.mrb[48].mxu1 %v1379_v59 }
 0x32b   : > { %v1239_v3 = vadd.f32 %v1924_v2, %v2603_v36  ;;  %v1350_v4 = vmax.f32 %v1236_v0, 0.0 }
 0x32d   : > { %v1351_v5 = vmax.f32 %v1239_v3, 0.0  ;;  %v1925_v6 = vpop.f32.mrb[28].mxu0 }
 0x32e   : > { %v1926_v7 = vpop.f32.mrb[29].mxu0 }
 0x32f   : > { %v1927_v8 = vadd.f32 %v1926_v7, %v1925_v6  ;;  %v1928_v9 = vpop.f32.mrb[30].mxu0  ;;  %v1380_v10 = vpack.c.bf16 %v1351_v5, %v1350_v4 }
 0x330   : > { %v1929_v11 = vpop.f32.mrb[31].mxu0 }
 0x331   : > { %v1244_v12 = vadd.f32 %v1927_v8, %v2603_v36  ;;  %v1930_v25 = vadd.f32 %v1929_v11, %v1928_v9  ;;  %2129 = vmatprep.mubr.bf16.mxu1 %v1380_v10 }
 0x333   : > { %v1247_v1 = vadd.f32 %v1930_v25, %v2603_v36  ;;  %v1352_v13 = vmax.f32 %v1244_v12, 0.0 }
 0x335   : > { %v1353_v62 = vmax.f32 %v1247_v1, 0.0  ;;  %v1931_v14 = vpop.f32.mrb[32].mxu0 }
 0x336   : > { %v1932_v15 = vpop.f32.mrb[33].mxu0 }
 0x337   : > { %v1933_v16 = vadd.f32 %v1932_v15, %v1931_v14  ;;  %v1934_v17 = vpop.f32.mrb[34].mxu0  ;;  %v1381_v18 = vpack.c.bf16 %v1353_v62, %v1352_v13 }
 0x338   : > { %v1935_v19 = vpop.f32.mrb[35].mxu0 }
 0x339   : > { %v1252_v20 = vadd.f32 %v1933_v16, %v2603_v36  ;;  %v1936_v21 = vadd.f32 %v1935_v19, %v1934_v17  ;;  %2130 = vmatmul.mubr.bf16.gmra.mrb[52].mxu1 %v1381_v18 }
 0x33b   : > { %v1255_v22 = vadd.f32 %v1936_v21, %v2603_v36  ;;  %v1354_v23 = vmax.f32 %v1252_v20, 0.0 }
 0x33d   : > { %v1355_v24 = vmax.f32 %v1255_v22, 0.0  ;;  %v1937_v26 = vpop.f32.mrb[36].mxu0 }
 0x33e   : > { %v1938_v27 = vpop.f32.mrb[37].mxu0 }
 0x33f   : > { %v1939_v28 = vadd.f32 %v1938_v27, %v1937_v26  ;;  %v1940_v29 = vpop.f32.mrb[38].mxu0  ;;  %v1382_v30 = vpack.c.bf16 %v1355_v24, %v1354_v23 }
 0x340   : > { %v1941_v31 = vpop.f32.mrb[39].mxu0 }
 0x341   : > { %v1260_v32 = vadd.f32 %v1939_v28, %v2603_v36  ;;  %v1942_v33 = vadd.f32 %v1941_v31, %v1940_v29  ;;  %2133 = vmatprep.mubr.bf16.mxu1 %v1382_v30 }
 0x343   : > { %v1263_v34 = vadd.f32 %v1942_v33, %v2603_v36  ;;  %v1356_v35 = vmax.f32 %v1260_v32, 0.0 }
 0x345   : > { %v1357_v37 = vmax.f32 %v1263_v34, 0.0  ;;  %v1943_v38 = vpop.f32.mrb[40].mxu0 }
 0x346   : > { %v1944_v39 = vpop.f32.mrb[41].mxu0 }
 0x347   : > { %v1945_v40 = vadd.f32 %v1944_v39, %v1943_v38  ;;  %v1946_v41 = vpop.f32.mrb[42].mxu0  ;;  %v1383_v42 = vpack.c.bf16 %v1357_v37, %v1356_v35 }
 0x348   : > { %v1947_v43 = vpop.f32.mrb[43].mxu0 }
 0x349   : > { %v1268_v44 = vadd.f32 %v1945_v40, %v2603_v36  ;;  %v1948_v45 = vadd.f32 %v1947_v43, %v1946_v41  ;;  %2134 = vmatmul.mubr.bf16.gmra.mrb[56].mxu1 %v1383_v42 }
 0x34b   : > { %v1271_v46 = vadd.f32 %v1948_v45, %v2603_v36  ;;  %v1358_v47 = vmax.f32 %v1268_v44, 0.0 }
 0x34d   : > { %v1359_v48 = vmax.f32 %v1271_v46, 0.0  ;;  %v1949_v49 = vpop.f32.mrb[44].mxu0 }
 0x34e   : > { %v1950_v50 = vpop.f32.mrb[45].mxu0 }
 0x34f   : > { %v1951_v51 = vadd.f32 %v1950_v50, %v1949_v49  ;;  %v1952_v52 = vpop.f32.mrb[46].mxu0  ;;  %v1384_v53 = vpack.c.bf16 %v1359_v48, %v1358_v47 }
 0x350   : > { %v1953_v54 = vpop.f32.mrb[47].mxu0 }
 0x351   : > { %v1276_v55 = vadd.f32 %v1951_v51, %v2603_v36  ;;  %v1954_v56 = vadd.f32 %v1953_v54, %v1952_v52  ;;  %2137 = vmatprep.mubr.bf16.mxu1 %v1384_v53 }
 0x353   : > { %v1279_v57 = vadd.f32 %v1954_v56, %v2603_v36  ;;  %v1360_v58 = vmax.f32 %v1276_v55, 0.0 }
 0x355   : > { %v1361_v59 = vmax.f32 %v1279_v57, 0.0  ;;  %v1955_v60 = vpop.f32.mrb[48].mxu0 }
 0x356   : > { %v1956_v61 = vpop.f32.mrb[49].mxu0 }
 0x357   : > { %v1957_v63 = vadd.f32 %v1956_v61, %v1955_v60  ;;  %v1958_v0 = vpop.f32.mrb[50].mxu0  ;;  %v1385_v2 = vpack.c.bf16 %v1361_v59, %v1360_v58 }
 0x358   : > { %v1959_v3 = vpop.f32.mrb[51].mxu0 }
 0x359   : > { %v1284_v4 = vadd.f32 %v1957_v63, %v2603_v36  ;;  %v1960_v5 = vadd.f32 %v1959_v3, %v1958_v0  ;;  %2138 = vmatmul.mubr.bf16.gmra.mrb[60].mxu1 %v1385_v2 }
 0x35b   : > { %v1287_v6 = vadd.f32 %v1960_v5, %v2603_v36  ;;  %v1362_v7 = vmax.f32 %v1284_v4, 0.0 }
 0x35d   : > { %v1363_v8 = vmax.f32 %v1287_v6, 0.0  ;;  %v1961_v9 = vpop.f32.mrb[52].mxu0 }
 0x35e   : > { %v1962_v10 = vpop.f32.mrb[53].mxu0 }
 0x35f   : > { %v1963_v11 = vadd.f32 %v1962_v10, %v1961_v9  ;;  %v1964_v12 = vpop.f32.mrb[54].mxu0  ;;  %v1386_v25 = vpack.c.bf16 %v1363_v8, %v1362_v7 }
 0x360   : > { %v1965_v1 = vpop.f32.mrb[55].mxu0 }
 0x361   : > { %v1292_v13 = vadd.f32 %v1963_v11, %v2603_v36  ;;  %v1966_v62 = vadd.f32 %v1965_v1, %v1964_v12  ;;  %2141 = vmatprep.mubr.bf16.mxu1 %v1386_v25 }
 0x363   : > { %v1295_v14 = vadd.f32 %v1966_v62, %v2603_v36  ;;  %v1364_v15 = vmax.f32 %v1292_v13, 0.0 }
 0x365   : > { %v1365_v16 = vmax.f32 %v1295_v14, 0.0  ;;  %v1967_v17 = vpop.f32.mrb[56].mxu0 }
 0x366   : > { %v1968_v18 = vpop.f32.mrb[57].mxu0 }
 0x367   : > { %v1969_v19 = vadd.f32 %v1968_v18, %v1967_v17  ;;  %v1970_v20 = vpop.f32.mrb[58].mxu0  ;;  %v1387_v21 = vpack.c.bf16 %v1365_v16, %v1364_v15 }
 0x368   : > { %v1971_v22 = vpop.f32.mrb[59].mxu0 }
 0x369   : > { %v1300_v23 = vadd.f32 %v1969_v19, %v2603_v36  ;;  %v1972_v24 = vadd.f32 %v1971_v22, %v1970_v20  ;;  %2142 = vmatmul.mubr.bf16.gmra.mrb[64].mxu1 %v1387_v21  ;;  %v2641_v21 = vld [vmem:[%s2722_s7] ss:$0 sm:$0xff] }
 0x36b   : > { %v1303_v26 = vadd.f32 %v1972_v24, %v2603_v36  ;;  %v1366_v27 = vmax.f32 %v1300_v23, 0.0 }
 0x36d   : > { %v1367_v28 = vmax.f32 %v1303_v26, 0.0  ;;  %v1973_v29 = vpop.f32.mrb[60].mxu0 }
 0x36e   : > { %v1974_v30 = vpop.f32.mrb[61].mxu0 }
 0x36f   : > { %v1975_v31 = vadd.f32 %v1974_v30, %v1973_v29  ;;  %v1976_v32 = vpop.f32.mrb[62].mxu0  ;;  %v1388_v33 = vpack.c.bf16 %v1367_v28, %v1366_v27 }
 0x370   : > { %v1977_v34 = vpop.f32.mrb[63].mxu0 }
 0x371   : > { %v1308_v35 = vadd.f32 %v1975_v31, %v2603_v36  ;;  %v1978_v37 = vadd.f32 %v1977_v34, %v1976_v32  ;;  %2145 = vmatprep.mubr.bf16.mxu1 %v1388_v33 }
 0x373   : > { %v1311_v38 = vadd.f32 %v1978_v37, %v2603_v36  ;;  %v1368_v39 = vmax.f32 %v1308_v35, 0.0 }
 0x375   : > { %v1369_v40 = vmax.f32 %v1311_v38, 0.0  ;;  %v1979_v41 = vpop.f32.mrb[64].mxu0 }
 0x376   : > { %v1980_v42 = vpop.f32.mrb[65].mxu0 }
 0x377   : > { %v1981_v43 = vadd.f32 %v1980_v42, %v1979_v41  ;;  %v1982_v44 = vpop.f32.mrb[66].mxu0  ;;  %v1389_v45 = vpack.c.bf16 %v1369_v40, %v1368_v39 }
 0x378   : > { %v1983_v46 = vpop.f32.mrb[67].mxu0 }
 0x379   : > { %v1316_v47 = vadd.f32 %v1981_v43, %v2603_v36  ;;  %v1984_v48 = vadd.f32 %v1983_v46, %v1982_v44  ;;  %2146 = vmatmul.mubr.bf16.gmra.mrb[68].mxu1 %v1389_v45 }
 0x37b   : > { %v1319_v49 = vadd.f32 %v1984_v48, %v2603_v36  ;;  %v1370_v50 = vmax.f32 %v1316_v47, 0.0 }
 0x37d   : > { %v1371_v51 = vmax.f32 %v1319_v49, 0.0  ;;  %v1985_v52 = vpop.f32.mrb[68].mxu0 }
 0x37e   : > { %v1986_v53 = vpop.f32.mrb[69].mxu0 }
 0x37f   : > { %v1987_v54 = vadd.f32 %v1986_v53, %v1985_v52  ;;  %v1988_v55 = vpop.f32.mrb[70].mxu0  ;;  %v1390_v56 = vpack.c.bf16 %v1371_v51, %v1370_v50 }
 0x380   : > { %v1989_v57 = vpop.f32.mrb[71].mxu0 }
 0x381   : > { %v1324_v58 = vadd.f32 %v1987_v54, %v2603_v36  ;;  %v1990_v59 = vadd.f32 %v1989_v57, %v1988_v55  ;;  %2149 = vmatprep.mubr.bf16.mxu1 %v1390_v56 }
 0x383   : > { %v1327_v60 = vadd.f32 %v1990_v59, %v2603_v36  ;;  %v1372_v61 = vmax.f32 %v1324_v58, 0.0 }
 0x385   : > { %v1373_v63 = vmax.f32 %v1327_v60, 0.0  ;;  %v1991_v0 = vpop.f32.mrb[72].mxu0 }
 0x386   : > { %v1992_v2 = vpop.f32.mrb[73].mxu0 }
 0x387   : > { %v1993_v3 = vadd.f32 %v1992_v2, %v1991_v0  ;;  %v1994_v4 = vpop.f32.mrb[74].mxu0  ;;  %v1391_v5 = vpack.c.bf16 %v1373_v63, %v1372_v61 }
 0x388   : > { %v1995_v6 = vpop.f32.mrb[75].mxu0 }
 0x389   : > { %v1332_v7 = vadd.f32 %v1993_v3, %v2603_v36  ;;  %v1996_v8 = vadd.f32 %v1995_v6, %v1994_v4  ;;  %2150 = vmatmul.mubr.bf16.gmra.mrb[72].mxu1 %v1391_v5 }
 0x38b   : > { %v1335_v9 = vadd.f32 %v1996_v8, %v2603_v36  ;;  %v1374_v10 = vmax.f32 %v1332_v7, 0.0 }
 0x38d   : > { %v1375_v11 = vmax.f32 %v1335_v9, 0.0  ;;  %v1997_v12 = vpop.f32.mrb[76].mxu0 }
 0x38e   : > { %v1998_v25 = vpop.f32.mrb[77].mxu0 }
 0x38f   : > { %v1999_v1 = vadd.f32 %v1998_v25, %v1997_v12  ;;  %v2000_v13 = vpop.f32.mrb[78].mxu0  ;;  %v1392_v62 = vpack.c.bf16 %v1375_v11, %v1374_v10 }
 0x390   : > { %v2001_v14 = vpop.f32.mrb[79].mxu0 }
 0x391   : > { %v1340_v15 = vadd.f32 %v1999_v1, %v2603_v36  ;;  %v2002_v16 = vadd.f32 %v2001_v14, %v2000_v13  ;;  %2153 = vmatprep.mubr.bf16.mxu1 %v1392_v62 }
 0x393   : > { %v1343_v17 = vadd.f32 %v2002_v16, %v2603_v36  ;;  %v1376_v18 = vmax.f32 %v1340_v15, 0.0 }
 0x395   : > { %v1377_v19 = vmax.f32 %v1343_v17, 0.0 }
 0x397   : > { %v1393_v20 = vpack.c.bf16 %v1377_v19, %v1376_v18 }
 0x399   : > { %2154 = vmatmul.mubr.bf16.gmra.mrb[76].mxu1 %v1393_v20 }
 0x3fc   : > { %v2127_v36 = vpop.f32.mrb[48].mxu1 }
 0x3fd   : > { %v1508_v22 = vadd.f32 %v2127_v36, %v2641_v21  ;;  %v1499_v23 = vpop.f32.mrb[49].mxu1 }
 0x3fe   : > { %v1500_v24 = vadd.f32 %v2641_v21, %v1499_v23  ;;  %v2128_v26 = vpop.f32.mrb[50].mxu1 }
 0x3ff   : > { %1628 = vst [vmem:[%s2646_s17 + $0x10] sm:$0xff] %v1508_v22  ;;  %v1511_v27 = vadd.f32 %v2128_v26, %v2641_v21  ;;  %v1502_v28 = vpop.f32.mrb[51].mxu1 }
 0x400   : > { %1626 = vst [vmem:[%s2646_s17] sm:$0xff] %v1500_v24  ;;  %v1503_v29 = vadd.f32 %v2641_v21, %v1502_v28 }
 0x401   : > { %1629 = vst [vmem:[%s2646_s17 + $0x18] sm:$0xff] %v1511_v27 }
 0x402   : > { %1627 = vst [vmem:[%s2646_s17 + $0x8] sm:$0xff] %v1503_v29 }
 0x40c   : > { %v2131_v30 = vpop.f32.mrb[52].mxu1 }
 0x40d   : > { %v1524_v31 = vadd.f32 %v2131_v30, %v2641_v21  ;;  %v1515_v32 = vpop.f32.mrb[53].mxu1 }
 0x40e   : > { %v1516_v33 = vadd.f32 %v2641_v21, %v1515_v32  ;;  %v2132_v34 = vpop.f32.mrb[54].mxu1 }
 0x40f   : > { %1632 = vst [vmem:[%s2646_s17 + $0x30] sm:$0xff] %v1524_v31  ;;  %v1527_v35 = vadd.f32 %v2132_v34, %v2641_v21  ;;  %v1518_v37 = vpop.f32.mrb[55].mxu1 }
 0x410   : > { %1630 = vst [vmem:[%s2646_s17 + $0x20] sm:$0xff] %v1516_v33  ;;  %v1519_v38 = vadd.f32 %v2641_v21, %v1518_v37 }
 0x411   : > { %1633 = vst [vmem:[%s2646_s17 + $0x38] sm:$0xff] %v1527_v35 }
 0x412   : > { %1631 = vst [vmem:[%s2646_s17 + $0x28] sm:$0xff] %v1519_v38 }
 0x41c   : > { %v2135_v39 = vpop.f32.mrb[56].mxu1 }
 0x41d   : > { %v1540_v40 = vadd.f32 %v2135_v39, %v2641_v21  ;;  %v1531_v41 = vpop.f32.mrb[57].mxu1 }
 0x41e   : > { %v1532_v42 = vadd.f32 %v2641_v21, %v1531_v41  ;;  %v2136_v43 = vpop.f32.mrb[58].mxu1 }
 0x41f   : > { %1636 = vst [vmem:[%s2646_s17 + $0x50] sm:$0xff] %v1540_v40  ;;  %v1543_v44 = vadd.f32 %v2136_v43, %v2641_v21  ;;  %v1534_v45 = vpop.f32.mrb[59].mxu1 }
 0x420   : > { %1634 = vst [vmem:[%s2646_s17 + $0x40] sm:$0xff] %v1532_v42  ;;  %v1535_v46 = vadd.f32 %v2641_v21, %v1534_v45 }
 0x421   : > { %1637 = vst [vmem:[%s2646_s17 + $0x58] sm:$0xff] %v1543_v44 }
 0x422   : > { %1635 = vst [vmem:[%s2646_s17 + $0x48] sm:$0xff] %v1535_v46 }
 0x42c   : > { %v2139_v47 = vpop.f32.mrb[60].mxu1 }
 0x42d   : > { %v1556_v48 = vadd.f32 %v2139_v47, %v2641_v21  ;;  %v1547_v49 = vpop.f32.mrb[61].mxu1 }
 0x42e   : > { %v1548_v50 = vadd.f32 %v2641_v21, %v1547_v49  ;;  %v2140_v51 = vpop.f32.mrb[62].mxu1 }
 0x42f   : > { %1640 = vst [vmem:[%s2646_s17 + $0x70] sm:$0xff] %v1556_v48  ;;  %v1559_v52 = vadd.f32 %v2140_v51, %v2641_v21  ;;  %v1550_v53 = vpop.f32.mrb[63].mxu1 }
 0x430   : > { %1638 = vst [vmem:[%s2646_s17 + $0x60] sm:$0xff] %v1548_v50  ;;  %v1551_v54 = vadd.f32 %v2641_v21, %v1550_v53 }
 0x431   : > { %1641 = vst [vmem:[%s2646_s17 + $0x78] sm:$0xff] %v1559_v52 }
 0x432   : > { %1639 = vst [vmem:[%s2646_s17 + $0x68] sm:$0xff] %v1551_v54 }
 0x43c   : > { %v2143_v55 = vpop.f32.mrb[64].mxu1 }
 0x43d   : > { %v1572_v56 = vadd.f32 %v2143_v55, %v2641_v21  ;;  %v1563_v57 = vpop.f32.mrb[65].mxu1 }
 0x43e   : > { %v1564_v58 = vadd.f32 %v2641_v21, %v1563_v57  ;;  %v2144_v59 = vpop.f32.mrb[66].mxu1 }
 0x43f   : > { %1644 = vst [vmem:[%s2646_s17 + $0x90] sm:$0xff] %v1572_v56  ;;  %v1575_v60 = vadd.f32 %v2144_v59, %v2641_v21  ;;  %v1566_v61 = vpop.f32.mrb[67].mxu1 }
 0x440   : > { %1642 = vst [vmem:[%s2646_s17 + $0x80] sm:$0xff] %v1564_v58  ;;  %v1567_v63 = vadd.f32 %v2641_v21, %v1566_v61 }
 0x441   : > { %1645 = vst [vmem:[%s2646_s17 + $0x98] sm:$0xff] %v1575_v60 }
 0x442   : > { %1643 = vst [vmem:[%s2646_s17 + $0x88] sm:$0xff] %v1567_v63 }
 0x44c   : > { %v2147_v0 = vpop.f32.mrb[68].mxu1 }
 0x44d   : > { %v1588_v2 = vadd.f32 %v2147_v0, %v2641_v21  ;;  %v1579_v3 = vpop.f32.mrb[69].mxu1 }
 0x44e   : > { %v1580_v4 = vadd.f32 %v2641_v21, %v1579_v3  ;;  %v2148_v5 = vpop.f32.mrb[70].mxu1 }
 0x44f   : > { %1648 = vst [vmem:[%s2646_s17 + $0xb0] sm:$0xff] %v1588_v2  ;;  %v1591_v6 = vadd.f32 %v2148_v5, %v2641_v21  ;;  %v1582_v7 = vpop.f32.mrb[71].mxu1 }
 0x450   : > { %1646 = vst [vmem:[%s2646_s17 + $0xa0] sm:$0xff] %v1580_v4  ;;  %v1583_v8 = vadd.f32 %v2641_v21, %v1582_v7 }
 0x451   : > { %1649 = vst [vmem:[%s2646_s17 + $0xb8] sm:$0xff] %v1591_v6 }
 0x452   : > { %1647 = vst [vmem:[%s2646_s17 + $0xa8] sm:$0xff] %v1583_v8 }
 0x45c   : > { %v2151_v9 = vpop.f32.mrb[72].mxu1 }
 0x45d   : > { %v1604_v10 = vadd.f32 %v2151_v9, %v2641_v21  ;;  %v1595_v11 = vpop.f32.mrb[73].mxu1 }
 0x45e   : > { %v1596_v12 = vadd.f32 %v2641_v21, %v1595_v11  ;;  %v2152_v25 = vpop.f32.mrb[74].mxu1 }
 0x45f   : > { %1652 = vst [vmem:[%s2646_s17 + $0xd0] sm:$0xff] %v1604_v10  ;;  %v1607_v1 = vadd.f32 %v2152_v25, %v2641_v21  ;;  %v1598_v13 = vpop.f32.mrb[75].mxu1 }
 0x460   : > { %1650 = vst [vmem:[%s2646_s17 + $0xc0] sm:$0xff] %v1596_v12  ;;  %v1599_v62 = vadd.f32 %v2641_v21, %v1598_v13 }
 0x461   : > { %1653 = vst [vmem:[%s2646_s17 + $0xd8] sm:$0xff] %v1607_v1 }
 0x462   : > { %1651 = vst [vmem:[%s2646_s17 + $0xc8] sm:$0xff] %v1599_v62 }
 0x46c   : > { %v2155_v14 = vpop.f32.mrb[76].mxu1 }
 0x46d   : > { %v1620_v15 = vadd.f32 %v2155_v14, %v2641_v21  ;;  %v1611_v16 = vpop.f32.mrb[77].mxu1 }
 0x46e   : > { %v1612_v17 = vadd.f32 %v2641_v21, %v1611_v16  ;;  %v2156_v18 = vpop.f32.mrb[78].mxu1 }
 0x46f   : > { %1656 = vst [vmem:[%s2646_s17 + $0xf0] sm:$0xff] %v1620_v15  ;;  %v1623_v19 = vadd.f32 %v2156_v18, %v2641_v21  ;;  %v1614_v20 = vpop.f32.mrb[79].mxu1 }
 0x470   : > { %1654 = vst [vmem:[%s2646_s17 + $0xe0] sm:$0xff] %v1612_v17  ;;  %v1615_v36 = vadd.f32 %v2641_v21, %v1614_v20 }
 0x471   : > { %1657 = vst [vmem:[%s2646_s17 + $0xf8] sm:$0xff] %v1623_v19 }
 0x472   : > { %1655 = vst [vmem:[%s2646_s17 + $0xe8] sm:$0xff] %v1615_v36 }
 0x473 PF: > { %s20_s27 = sadd.s32 1, %s2341_s27  }
 0x474   : > { %p17_p10 = scmp.ge.s32.totalorder %s20_s27, 4  }
 0x476   :  { %19 = sbr.rel (!%p17_p10) target bundleno = 2 (0x2), region = 94 }
 0x47d   :  { %1680 = vsyncpa [#allocation3], 1 }
 0x47e   :  { %1682 = vsyncpa [#allocation3 + $0x1], 1 }
 0x47f   :  { %1683 = vsyncpa [#allocation5], 1 }

</bundles_post_ra>
